<compile_context>
chip_gen: v7x
topology: tpu7x:2x2x1
jax: 0.10.0
libtpu: 0.0.40
codegen_flags: <defaults>
</compile_context>

<pallas_src>
import jax
import jax.numpy as jnp
from jax.experimental import pallas as pl
from jax.experimental.pallas import tpu as pltpu


_DEFAULT_TARGET_BLOCK_BYTES = 4 * 1024 * 1024   # ~2-6 MiB blocks hit HBM roofline
_VMEM_LIMIT_BYTES = 32 * 1024 * 1024            # > v5e's 16 MiB default, < v7x 64 MiB phys
_MIN_PALLAS_BYTES = 1 * 1024 * 1024             # below this, fused XLA add is faster


def _add_kernel(x_ref, pos_ref, o_ref):
    # Pure elementwise add. pos block broadcasts over the row/batch dim when
    # shaped (1, lane_tile); with the 3-D layout the shapes match exactly.
    o_ref[...] = x_ref[...] + pos_ref[...]


def _round_down(x, m):
    return (x // m) * m


def _sublane_multiple(dtype):
    # 8 x 32-bit sublanes per vreg; sub-32-bit dtypes pack 2x / 4x deeper.
    itemsize = jnp.dtype(dtype).itemsize
    return {4: 8, 2: 16, 1: 32}.get(itemsize, 8)


def positional_encoding(x, pos_embed, *,
                        target_block_bytes=_DEFAULT_TARGET_BLOCK_BYTES,
                        min_pallas_bytes=_MIN_PALLAS_BYTES):
    """x: (B, N, D); pos_embed: (1, N, D). Returns x + pos_embed."""
    B, N, D = x.shape
    assert pos_embed.shape == (1, N, D)
    # Match model dtype (the torch module's pos_embed lives in model dtype).
    pos_embed = pos_embed.astype(x.dtype)
    itemsize = jnp.dtype(x.dtype).itemsize
    total_bytes = B * N * D * itemsize

    # Small-input bailout: launch + per-step overhead dominates tiny inputs;
    # plain XLA fuses the add into its producer/consumer.
    if total_bytes < min_pallas_bytes:
        return x + pos_embed

    sub = _sublane_multiple(x.dtype)
    elems_budget = max(128, target_block_bytes // itemsize)
    cost = pl.CostEstimate(flops=B * N * D, transcendentals=0,
                           bytes_accessed=(2 * B * N * D + N * D) * itemsize)

    # ---- Layout B: small batch + lane-aligned D -> 3-D tiling over patches.
    # With B < sublane multiple, a flattened (B, N*D) layout leaves most vreg
    # sublanes empty (heavily masked stores). Tiling N keeps sublanes full.
    if (B < sub) and (D % 128 == 0) and (sub * D <= elems_budget):
        n_budget = max(1, elems_budget // D)
        n_tile = N if N <= n_budget else max(sub, _round_down(n_budget, sub))
        # N-chunks outer, batch inner -> pos block resident across inner steps.
        grid = (pl.cdiv(N, n_tile), B)
        out = pl.pallas_call(
            _add_kernel,
            out_shape=jax.ShapeDtypeStruct((B, N, D), x.dtype),
            grid_spec=pltpu.PrefetchScalarGridSpec(
                num_scalar_prefetch=0,
                grid=grid,
                in_specs=[
                    pl.BlockSpec((1, n_tile, D), lambda n, b: (b, n, 0)),
                    pl.BlockSpec((1, n_tile, D), lambda n, b: (0, n, 0)),
                ],
                out_specs=pl.BlockSpec((1, n_tile, D), lambda n, b: (b, n, 0)),
            ),
            compiler_params=pltpu.CompilerParams(
                dimension_semantics=("parallel", "parallel"),
                vmem_limit_bytes=_VMEM_LIMIT_BYTES,
            ),
            cost_estimate=cost,
        )(x, pos_embed)
        return out

    # ---- Layout A: lane-dense flatten (B, N*D) — wide unmasked lane stores.
    ND = N * D
    x2 = x.reshape(B, ND)
    pos2 = pos_embed.reshape(1, ND)

    min_rows = sub if B >= sub else B
    # Lanes: as wide as the budget allows (lane_tile == ND means each x block
    # is one contiguous HBM DMA); otherwise a multiple of 128 with cdiv-masked
    # partial last block.
    lane_budget = max(128, elems_budget // max(1, min_rows))
    lane_tile = ND if ND <= lane_budget else _round_down(lane_budget, 128)
    # Rows: fill the remaining budget; full extent or a sublane multiple.
    rows_budget = max(min_rows, elems_budget // lane_tile)
    row_tile = B if B <= rows_budget else _round_down(rows_budget, sub)

    lane_blocks = pl.cdiv(ND, lane_tile)
    row_blocks = pl.cdiv(B, row_tile)

    # v7x megacore: keep >= 2 parallel grid steps when cheaply possible so the
    # second TensorCore (and its DMA engines) isn't idle.
    if lane_blocks * row_blocks == 1 and row_tile >= 2 * sub:
        row_tile = _round_down(max(sub, row_tile // 2), sub)
        row_blocks = pl.cdiv(B, row_tile)

    # Lane-chunks outermost, row-chunks innermost: pos block index depends only
    # on the outer axis, so the broadcast operand stays resident across the
    # inner steps (no redundant DMA).
    grid = (lane_blocks, row_blocks)

    out2 = pl.pallas_call(
        _add_kernel,
        out_shape=jax.ShapeDtypeStruct((B, ND), x.dtype),
        grid_spec=pltpu.PrefetchScalarGridSpec(
            num_scalar_prefetch=0,
            grid=grid,
            in_specs=[
                pl.BlockSpec((row_tile, lane_tile), lambda c, r: (r, c)),
                pl.BlockSpec((1, lane_tile), lambda c, r: (0, c)),
            ],
            out_specs=pl.BlockSpec((row_tile, lane_tile), lambda c, r: (r, c)),
        ),
        compiler_params=pltpu.CompilerParams(
            dimension_semantics=("parallel", "parallel"),
            vmem_limit_bytes=_VMEM_LIMIT_BYTES,
        ),
        cost_estimate=cost,
    )(x2, pos2)
    return out2.reshape(B, N, D)


if __name__ == "__main__":
    key = jax.random.PRNGKey(0)
    kx, kp = jax.random.split(key)

    # Shapes implied by the module: (batch, num_patches, embed_dim).
    B, N, D = 2, 8, 32
    x = jax.random.normal(kx, (B, N, D), dtype=jnp.float32)
    # The torch module creates pos_embed lazily as randn(1, N, D) on the first
    # forward; here it is an explicit, deterministically-initialized input.
    pos_embed = jax.random.normal(kp, (1, N, D), dtype=jnp.float32)
    ref = x + pos_embed

    # 1) Force the Pallas path at the tiny spec shape (bypass the bailout).
    out = jax.block_until_ready(positional_encoding(x, pos_embed, min_pallas_bytes=0))
    assert out.shape == (B, N, D)
    assert jnp.allclose(out, ref, atol=1e-6), "layout-A (tiny) mismatch"

    # 2) Default path: small-input bailout (plain fused add).
    out_bail = jax.block_until_ready(positional_encoding(x, pos_embed))
    assert jnp.allclose(out_bail, ref, atol=1e-6), "bailout mismatch"

    # 3) Small-batch + lane-aligned D: exercises the 3-D (layout-B) tiling.
    xb = jax.random.normal(kx, (2, 16, 128), dtype=jnp.float32)
    pb = jax.random.normal(kp, (1, 16, 128), dtype=jnp.float32)
    ob = jax.block_until_ready(positional_encoding(xb, pb, min_pallas_bytes=0))
    assert jnp.allclose(ob, xb + pb, atol=1e-6), "layout-B mismatch"

    # 4) Non-divisible B / N*D with a deliberately tiny block budget:
    #    exercises the cdiv partial (masked) block path.
    xc = jax.random.normal(kx, (10, 9, 40), dtype=jnp.float32)
    pc = jax.random.normal(kp, (1, 9, 40), dtype=jnp.float32)
    oc = jax.block_until_ready(
        positional_encoding(xc, pc, min_pallas_bytes=0, target_block_bytes=4096))
    assert jnp.allclose(oc, xc + pc, atol=1e-6), "masked-block mismatch"

    print("KERNEL_OK")
</pallas_src>

<mosaic_0001>
module attributes {stable_mosaic.version = 11 : i64} {
  func.func @_add_kernel(%arg0: i32, %arg1: i32, %arg2: memref<2x256xf32, #tpu.memory_space<vmem>>, %arg3: memref<1x256xf32, #tpu.memory_space<vmem>>, %arg4: memref<2x256xf32, #tpu.memory_space<vmem>>) attributes {dimension_semantics = [#tpu.dimension_semantics<parallel>, #tpu.dimension_semantics<parallel>], iteration_bounds = array<i64: 1, 1>, scalar_prefetch = 0 : i64, scratch_operands = 0 : i64, tpu.core_type = #tpu.core_type<tc>, window_params = [{transform_indices = @transform_0, window_bounds = array<i64: 2, 256>}, {transform_indices = @transform_1, window_bounds = array<i64: 1, 256>}, {transform_indices = @transform_2, window_bounds = array<i64: 2, 256>}]} {
    %c0 = arith.constant 0 : index
    %c0_0 = arith.constant 0 : index
    %0 = vector.load %arg2[%c0, %c0_0] : memref<2x256xf32, #tpu.memory_space<vmem>>, vector<2x256xf32>
    %c0_1 = arith.constant 0 : index
    %c0_2 = arith.constant 0 : index
    %1 = vector.load %arg3[%c0_1, %c0_2] : memref<1x256xf32, #tpu.memory_space<vmem>>, vector<1x256xf32>
    %2 = vector.broadcast %1 : vector<1x256xf32> to vector<2x256xf32>
    %3 = arith.addf %0, %2 : vector<2x256xf32>
    %c0_3 = arith.constant 0 : index
    %c0_4 = arith.constant 0 : index
    %4 = vector.load %arg4[%c0_3, %c0_4] : memref<2x256xf32, #tpu.memory_space<vmem>>, vector<2x256xf32>
    tpu.vector_store %arg4[%c0_3, %c0_4], %3 {strides = array<i32>} : memref<2x256xf32, #tpu.memory_space<vmem>>, vector<2x256xf32>,
    return
  }
  func.func @transform_0(%arg0: i32, %arg1: i32) -> (i32, i32) {
    %c0_i32 = arith.constant 0 : i32
    return %arg1, %arg0 : i32, i32
  }
  func.func @transform_1(%arg0: i32, %arg1: i32) -> (i32, i32) {
    %c0_i32 = arith.constant 0 : i32
    %c0_i32_0 = arith.constant 0 : i32
    return %c0_i32, %arg0 : i32, i32
  }
  func.func @transform_2(%arg0: i32, %arg1: i32) -> (i32, i32) {
    %c0_i32 = arith.constant 0 : i32
    return %arg1, %arg0 : i32, i32
  }
}

</mosaic_0001>

<bundles_post_ra>
// kernel: tpu_custom_call.1
= control target key start
LH: loop header
LB: loop body
LE: loop exit
PB: predicated region body
PF: predicated region fallthrough
CT: control target
= control target key end

     0   :  { %7 = vsyncpa [#allocation3], 0  ;;  %s157_s0 = inlined_call_operand.hbm [shape: f32[2,256], index: 0, kind: input, shape index: {}]   ;;  %s158_s1 = inlined_call_operand.vmem [shape: f32[1,256], index: 1, kind: input, shape index: {}]   ;;  %s159_s2 = inlined_call_operand.hbm [shape: f32[2,256], index: 2, kind: output, shape index: {}]  }
   0x1   :  { %8 = vsyncpa [#allocation4], 0  ;;  %s112_s9 = smov [#allocation2]   ;;  %s64_s13 = scalar_lea.hbm %s157_s0, 64 }
   0x2   :  { %s15_s10 = sshll.u32 %s112_s9, 4  ;;  %p65_p0 = scmp.ne.s32.totalorder %s157_s0, %s64_s13  ;;  %s16_s10 = int_to_ptr.vmem [resolvable:$true] %s15_s10 }
   0x3   :  { %p68_p1 = scmp.lt.u32.totalorder %s64_s13, %s157_s0 }
   0x5   :  { %p70_p2 = pnand %p68_p1, %p65_p0 }
   0x7   :  { %73 = shalt.err (!%p70_p2)
}
   0x8   :  { %s74_s18 = scalar_lea.vmem %s16_s10, 64  ;;  %p79_p4 = scmp.lt.s32.totalorder %s16_s10, %s16_s10 }
   0x9   :  { %p75_p3 = scmp.ne.s32.totalorder %s16_s10, %s74_s18  ;;  %p80_p5 = scmp.lt.s32.totalorder %s74_s18, %s74_s18 }
   0xb   :  { %p81_p6 = por %p80_p5, %p79_p4 }
   0xd   :  { %p82_p7 = pnand %p81_p6, %p75_p3 }
   0xf   :  { %85 = shalt.err (!%p82_p7)
}
  0x10   :  { %18 = dma.hbm_to_vmem [thread:$0]  %s157_s0, 64, %s16_s10, [#allocation3]  }
  0x11   :  { %108 = dma.done.wait [#allocation3], 64  }
  0x12   :  { %109 = vsyncadd [#allocation3], 4294967232  ;;  %v27_v0 = vlaneseq  ;;  %v113_v1 = vmov 1983009808   ;;  %v25_v7 = vld [vmem:[%s158_s1] sm:$0x3] }
  0x13   :  { %v37_v2 = vunpack.c.l.s4 %v113_v1  ;;  %v24_v12 = vld [vmem:[#allocation2] sm:$0xf]  ;;  %s114_s23 = smov [#allocation5]  }
  0x14   :  { %v28_v3 = vshrl.u32 %v27_v0, 7  ;;  %s52_s0 = sshll.u32 %s114_s23, 4  ;;  %s53_s0 = int_to_ptr.vmem [resolvable:$true] %s52_s0 }
  0x15   :  { %v38_v6 = vunpack.c.0.s8 %v37_v2  ;;  %s86_s24 = scalar_lea.vmem %s53_s0, 64  ;;  %p91_p9 = scmp.lt.s32.totalorder %s53_s0, %s53_s0 }
  0x16   :  { %v29_v4 = vsub.s32 0, %v28_v3  ;;  %v33_v5 = vsub.s32 1, %v28_v3  ;;  %p87_p8 = scmp.ne.s32.totalorder %s53_s0, %s86_s24  ;;  %p92_p10 = scmp.lt.s32.totalorder %s86_s24, %s86_s24 }
  0x17   :  { %v41_v10 = vsub.s32 %v38_v6, %v28_v3 }
  0x18   :  { %v30_v8 = vrot.slane %v25_v7, %v29_v4  ;;  %v34_v9 = vrot.slane %v25_v7, %v33_v5  ;;  %p93_p11 = por %p92_p10, %p91_p9 }
  0x1a   :  { %v35_v11 = vcombine.low %v30_v8, %v34_v9  ;;  %p94_p12 = pnand %p93_p11, %p87_p8 }
  0x1c   :  { %v42_v13 = vrot.slane %v35_v11, %v41_v10 }
  0x1e   :  { %v44_v14 = vadd.f32 %v42_v13, %v24_v12 }
  0x20   :  { %45 = vst [vmem:[#allocation5] sm:$0xf] %v44_v14 }
  0x21   :  { %97 = shalt.err (!%p94_p12)
}
  0x22   :  { %s98_s26 = scalar_lea.hbm %s159_s2, 64 }
  0x23   :  { %p99_p13 = scmp.ne.s32.totalorder %s159_s2, %s98_s26  ;;  %p102_p0 = scmp.lt.u32.totalorder %s98_s26, %s159_s2 }
  0x25   :  { %p104_p1 = pnand %p102_p0, %p99_p13 }
  0x27   :  { %107 = shalt.err (!%p104_p1)
}
  0x28   :  { %55 = dma.vmem_to_hbm [thread:$0]  %s53_s0, 64, %s159_s2, [#allocation4]  }
  0x29   :  { %110 = dma.done.wait [#allocation4], 64  }
  0x2a   :  { %111 = vsyncadd [#allocation4], 4294967232 }
  0x2b   :  { %59 = vsyncpa [#allocation3], 1 }
  0x2c   :  { %60 = vsyncpa [#allocation4], 1 }

</bundles_post_ra>
